<compile_context>
chip_gen: v7x
topology: tpu7x:2x2x1
jax: 0.10.0
libtpu: 0.0.40
codegen_flags: <defaults>
</compile_context>

<pallas_src>
import jax
import jax.numpy as jnp
from jax.experimental import pallas as pl
from jax.experimental.pallas import tpu as pltpu


def mlp_kernel(x_ref, w1_ref, b1_ref, w2_ref, b2_ref, o_ref, acc_ref):
    """fc2(fc1(x)) with the fc1 contraction tiled along the K grid axis."""
    k = pl.program_id(1)

    @pl.when(k == 0)
    def _():
        acc_ref[...] = jnp.zeros_like(acc_ref)

    # Partial fc1 product for this K tile: (tb, tk) @ (tk, Hp) -> f32 accum.
    acc_ref[...] += jnp.dot(x_ref[...], w1_ref[...],
                            preferred_element_type=jnp.float32)

    @pl.when(k == pl.num_programs(1) - 1)
    def _():
        h = acc_ref[...] + b1_ref[...]                      # f32 epilogue (VPU)
        y = jnp.dot(h.astype(w2_ref.dtype), w2_ref[...],
                    preferred_element_type=jnp.float32) + b2_ref[...]
        o_ref[...] = y.astype(o_ref.dtype)


def _round_up(x, m):
    return ((x + m - 1) // m) * m


def nn_forward(x, w1, b1, w2, b2, *, tb=256, tk=512,
               compute_dtype=jnp.bfloat16):
    """Forward pass of NN.

    x:  (B, K) activations
    w1: (H, K), b1: (H,)   -- PyTorch nn.Linear layout
    w2: (C, H), b2: (C,)
    """
    B, K = x.shape
    H = w1.shape[0]
    C = w2.shape[0]
    out_dtype = x.dtype

    LANE = 128
    Hp = _round_up(H, LANE)          # hidden padded to full lanes
    Cp = _round_up(C, LANE)          # classes padded -> lane-dense output store

    # --- K tiling: pick tk (multiple of 128) that divides the lane-padded K,
    # so x / W1 only ever get <= 127 columns of zero padding.
    k_pad = _round_up(K, LANE)
    tk_cap = max(LANE, (min(tk, k_pad) // LANE) * LANE)
    tk_sel = LANE
    for cand in range(tk_cap, LANE - 1, -LANE):
        if k_pad % cand == 0:
            tk_sel = cand
            break
    tk = tk_sel

    # --- Batch tiling: multiple of 16 (bf16 sublane packing), capped at tb.
    tb = min(tb, _round_up(B, 16))
    b_pad = _round_up(B, tb)

    # Wrapper-side layout work (trace-time for fixed weights): transpose once,
    # zero-pad H/C/K, cast matmul operands to bf16. Biases stay f32.
    w1_t = jnp.zeros((k_pad, Hp), compute_dtype).at[:K, :H].set(
        w1.T.astype(compute_dtype))
    w2_t = jnp.zeros((Hp, Cp), compute_dtype).at[:H, :C].set(
        w2.T.astype(compute_dtype))
    b1_2d = jnp.zeros((1, Hp), jnp.float32).at[:, :H].set(
        b1.astype(jnp.float32).reshape(1, H))
    b2_2d = jnp.zeros((1, Cp), jnp.float32).at[:, :C].set(
        b2.astype(jnp.float32).reshape(1, C))

    x_p = x.astype(compute_dtype)
    if b_pad != B or k_pad != K:
        x_p = jnp.pad(x_p, ((0, b_pad - B), (0, k_pad - K)))

    grid = (b_pad // tb, k_pad // tk)

    # TODO(synk): on v7x, single-buffer the constant b1/w2/b2 BlockSpecs via
    # pipeline_mode=pl.Buffered(1) if VMEM ever gets tight (they are tiny here).
    out = pl.pallas_call(
        mlp_kernel,
        out_shape=jax.ShapeDtypeStruct((b_pad, Cp), out_dtype),
        grid=grid,
        in_specs=[
            pl.BlockSpec((tb, tk), lambda i, k: (i, k)),    # x: streams B and K
            pl.BlockSpec((tk, Hp), lambda i, k: (k, 0)),    # W1^T: streams K
            pl.BlockSpec((1, Hp), lambda i, k: (0, 0)),     # b1: VMEM resident
            pl.BlockSpec((Hp, Cp), lambda i, k: (0, 0)),    # W2^T: VMEM resident
            pl.BlockSpec((1, Cp), lambda i, k: (0, 0)),     # b2: VMEM resident
        ],
        out_specs=pl.BlockSpec((tb, Cp), lambda i, k: (i, 0)),
        scratch_shapes=[pltpu.VMEM((tb, Hp), jnp.float32)],
        compiler_params=pltpu.CompilerParams(
            dimension_semantics=("parallel", "arbitrary"),
        ),
    )(x_p, w1_t, b1_2d, w2_t, b2_2d)

    return out[:B, :C]


def init_params(key, input_size, hidden, num_classes):
    k1, k2, k3, k4 = jax.random.split(key, 4)
    # PyTorch nn.Linear default: U(-1/sqrt(fan_in), 1/sqrt(fan_in))
    lim1 = 1.0 / jnp.sqrt(input_size)
    lim2 = 1.0 / jnp.sqrt(hidden)
    w1 = jax.random.uniform(k1, (hidden, input_size), jnp.float32, -lim1, lim1)
    b1 = jax.random.uniform(k2, (hidden,), jnp.float32, -lim1, lim1)
    w2 = jax.random.uniform(k3, (num_classes, hidden), jnp.float32, -lim2, lim2)
    b2 = jax.random.uniform(k4, (num_classes,), jnp.float32, -lim2, lim2)
    return w1, b1, w2, b2


if __name__ == "__main__":
    # Small shapes consistent with the module: batch=2, flattened features=1024
    # (stand-in for 3*320*180 -- the K-tiled kernel handles the real size too),
    # hidden=50, num_classes=2.
    batch = 2
    input_size = 1024
    hidden = 50
    num_classes = 2

    key = jax.random.PRNGKey(0)
    kx, kp = jax.random.split(key)
    x = jax.random.normal(kx, (batch, input_size), jnp.float32)
    w1, b1, w2, b2 = init_params(kp, input_size, hidden, num_classes)

    out = nn_forward(x, w1, b1, w2, b2)
    out = jax.block_until_ready(out)

    # Reference check in plain JAX (same math as the PyTorch module).
    # bf16 matmul operands with f32 accumulation -> relaxed tolerance.
    ref = (x @ w1.T + b1) @ w2.T + b2
    assert out.shape == (batch, num_classes)
    assert jnp.allclose(out, ref, atol=3e-2, rtol=3e-2), \
        float(jnp.max(jnp.abs(out - ref)))

    print("KERNEL_OK")
</pallas_src>

<mosaic_0001>
module attributes {stable_mosaic.version = 11 : i64} {
  func.func @mlp_kernel(%arg0: i32, %arg1: i32, %arg2: memref<16x512xbf16, #tpu.memory_space<vmem>>, %arg3: memref<512x128xbf16, #tpu.memory_space<vmem>>, %arg4: memref<1x128xf32, #tpu.memory_space<vmem>>, %arg5: memref<128x128xbf16, #tpu.memory_space<vmem>>, %arg6: memref<1x128xf32, #tpu.memory_space<vmem>>, %arg7: memref<16x128xf32, #tpu.memory_space<vmem>>, %arg8: memref<16x128xf32, #tpu.memory_space<vmem>>) attributes {dimension_semantics = [#tpu.dimension_semantics<parallel>, #tpu.dimension_semantics<arbitrary>], iteration_bounds = array<i64: 1, 2>, scalar_prefetch = 0 : i64, scratch_operands = 1 : i64, tpu.core_type = #tpu.core_type<tc>, window_params = [{transform_indices = @transform_0, window_bounds = array<i64: 16, 512>}, {transform_indices = @transform_1, window_bounds = array<i64: 512, 128>}, {pipeline_mode = #tpu.pipeline_mode<synchronous>, transform_indices = @transform_2, window_bounds = array<i64: 1, 128>}, {pipeline_mode = #tpu.pipeline_mode<synchronous>, transform_indices = @transform_3, window_bounds = array<i64: 128, 128>}, {pipeline_mode = #tpu.pipeline_mode<synchronous>, transform_indices = @transform_4, window_bounds = array<i64: 1, 128>}, {transform_indices = @transform_5, window_bounds = array<i64: 16, 128>}]} {
    %c0_i32 = arith.constant 0 : i32
    %0 = arith.cmpi eq, %arg1, %c0_i32 : i32
    %1 = arith.extui %0 : i1 to i32
    %c0_i32_0 = arith.constant 0 : i32
    %2 = arith.cmpi ne, %1, %c0_i32_0 : i32
    scf.if %2 {
      %cst_9 = arith.constant 0.000000e+00 : f32
      %12 = vector.broadcast %cst_9 : f32 to vector<16x128xf32>
      %c0_10 = arith.constant 0 : index
      %c0_11 = arith.constant 0 : index
      %13 = vector.load %arg8[%c0_10, %c0_11] : memref<16x128xf32, #tpu.memory_space<vmem>>, vector<16x128xf32>
      tpu.vector_store %arg8[%c0_10, %c0_11], %12 {strides = array<i32>} : memref<16x128xf32, #tpu.memory_space<vmem>>, vector<16x128xf32>,
    } else {
    }
    %c0 = arith.constant 0 : index
    %c0_1 = arith.constant 0 : index
    %3 = vector.load %arg8[%c0, %c0_1] : memref<16x128xf32, #tpu.memory_space<vmem>>, vector<16x128xf32>
    %c0_2 = arith.constant 0 : index
    %c0_3 = arith.constant 0 : index
    %4 = vector.load %arg2[%c0_2, %c0_3] : memref<16x512xbf16, #tpu.memory_space<vmem>>, vector<16x512xbf16>
    %c0_4 = arith.constant 0 : index
    %c0_5 = arith.constant 0 : index
    %5 = vector.load %arg3[%c0_4, %c0_5] : memref<512x128xbf16, #tpu.memory_space<vmem>>, vector<512x128xbf16>
    %cst = arith.constant dense<0.000000e+00> : vector<16x128xf32>
    %6 = tpu.matmul %4, %5, %cst {dimension_numbers = #tpu.dot_dimension_numbers<[1], [0], [0], [1], [0, 0, 1, 1], [], []>} : vector<16x512xbf16>, vector<512x128xbf16>, vector<16x128xf32> -> vector<16x128xf32>
    %7 = arith.addf %3, %6 : vector<16x128xf32>
    %c0_6 = arith.constant 0 : index
    %c0_7 = arith.constant 0 : index
    %8 = vector.load %arg8[%c0_6, %c0_7] : memref<16x128xf32, #tpu.memory_space<vmem>>, vector<16x128xf32>
    tpu.vector_store %arg8[%c0_6, %c0_7], %7 {strides = array<i32>} : memref<16x128xf32, #tpu.memory_space<vmem>>, vector<16x128xf32>,
    %c1_i32 = arith.constant 1 : i32
    %9 = arith.cmpi eq, %arg1, %c1_i32 : i32
    %10 = arith.extui %9 : i1 to i32
    %c0_i32_8 = arith.constant 0 : i32
    %11 = arith.cmpi ne, %10, %c0_i32_8 : i32
    scf.if %11 {
      %c0_9 = arith.constant 0 : index
      %c0_10 = arith.constant 0 : index
      %12 = vector.load %arg8[%c0_9, %c0_10] : memref<16x128xf32, #tpu.memory_space<vmem>>, vector<16x128xf32>
      %c0_11 = arith.constant 0 : index
      %c0_12 = arith.constant 0 : index
      %13 = vector.load %arg4[%c0_11, %c0_12] : memref<1x128xf32, #tpu.memory_space<vmem>>, vector<1x128xf32>
      %14 = vector.broadcast %13 : vector<1x128xf32> to vector<16x128xf32>
      %15 = arith.addf %12, %14 : vector<16x128xf32>
      %16 = arith.truncf %15 : vector<16x128xf32> to vector<16x128xbf16>
      %c0_13 = arith.constant 0 : index
      %c0_14 = arith.constant 0 : index
      %17 = vector.load %arg5[%c0_13, %c0_14] : memref<128x128xbf16, #tpu.memory_space<vmem>>, vector<128x128xbf16>
      %cst_15 = arith.constant dense<0.000000e+00> : vector<16x128xf32>
      %18 = tpu.matmul %16, %17, %cst_15 {dimension_numbers = #tpu.dot_dimension_numbers<[1], [0], [0], [1], [0, 0, 1, 1], [], []>} : vector<16x128xbf16>, vector<128x128xbf16>, vector<16x128xf32> -> vector<16x128xf32>
      %c0_16 = arith.constant 0 : index
      %c0_17 = arith.constant 0 : index
      %19 = vector.load %arg6[%c0_16, %c0_17] : memref<1x128xf32, #tpu.memory_space<vmem>>, vector<1x128xf32>
      %20 = vector.broadcast %19 : vector<1x128xf32> to vector<16x128xf32>
      %21 = arith.addf %18, %20 : vector<16x128xf32>
      %c0_18 = arith.constant 0 : index
      %c0_19 = arith.constant 0 : index
      %22 = vector.load %arg7[%c0_18, %c0_19] : memref<16x128xf32, #tpu.memory_space<vmem>>, vector<16x128xf32>
      tpu.vector_store %arg7[%c0_18, %c0_19], %21 {strides = array<i32>} : memref<16x128xf32, #tpu.memory_space<vmem>>, vector<16x128xf32>,
    } else {
    }
    return
  }
  func.func @transform_0(%arg0: i32, %arg1: i32) -> (i32, i32) {
    %c0_i32 = arith.constant 0 : i32
    return %arg0, %arg1 : i32, i32
  }
  func.func @transform_1(%arg0: i32, %arg1: i32) -> (i32, i32) {
    %c0_i32 = arith.constant 0 : i32
    %c0_i32_0 = arith.constant 0 : i32
    return %arg1, %c0_i32 : i32, i32
  }
  func.func @transform_2(%arg0: i32, %arg1: i32) -> (i32, i32) {
    %c0_i32 = arith.constant 0 : i32
    %c0_i32_0 = arith.constant 0 : i32
    %c0_i32_1 = arith.constant 0 : i32
    return %c0_i32, %c0_i32_0 : i32, i32
  }
  func.func @transform_3(%arg0: i32, %arg1: i32) -> (i32, i32) {
    %c0_i32 = arith.constant 0 : i32
    %c0_i32_0 = arith.constant 0 : i32
    %c0_i32_1 = arith.constant 0 : i32
    return %c0_i32, %c0_i32_0 : i32, i32
  }
  func.func @transform_4(%arg0: i32, %arg1: i32) -> (i32, i32) {
    %c0_i32 = arith.constant 0 : i32
    %c0_i32_0 = arith.constant 0 : i32
    %c0_i32_1 = arith.constant 0 : i32
    return %c0_i32, %c0_i32_0 : i32, i32
  }
  func.func @transform_5(%arg0: i32, %arg1: i32) -> (i32, i32) {
    %c0_i32 = arith.constant 0 : i32
    %c0_i32_0 = arith.constant 0 : i32
    return %arg0, %c0_i32 : i32, i32
  }
}

</mosaic_0001>

<bundles_post_ra>
// kernel: tpu_custom_call.1
= control target key start
LH: loop header
LB: loop body
LE: loop exit
PB: predicated region body
PF: predicated region fallthrough
CT: control target
= control target key end

     0   :  { %s1698_s0 = inlined_call_operand.hbm [shape: bf16[16,1024], index: 0, kind: input, shape index: {}]   ;;  %s1699_s1 = inlined_call_operand.hbm [shape: bf16[1024,128], index: 1, kind: input, shape index: {}]   ;;  %s1700_s2 = inlined_call_operand.vmem [shape: f32[1,128], index: 2, kind: input, shape index: {}]   ;;  %s1701_s3 = inlined_call_operand.hbm [shape: bf16[128,128], index: 3, kind: input, shape index: {}]   ;;  %s1702_s4 = inlined_call_operand.vmem [shape: f32[1,128], index: 4, kind: input, shape index: {}]   ;;  %s1703_s5 = inlined_call_operand.hbm [shape: f32[16,128], index: 5, kind: output, shape index: {}]  }
   0x1   :  { %1711 = sst [smem:[#allocation15_spill]] %s1698_s0 }
   0x2   :  { %1712 = sst [smem:[#allocation16_spill]] %s1701_s3 }
   0x3   :  { %10 = vsyncpa [#allocation4], 0 }
   0x4   :  { %12 = vsyncpa [#allocation4 + $0x1], 0 }
   0x5   :  { %13 = vsyncpa [#allocation7], 0 }
   0x6   :  { %15 = vsyncpa [#allocation7 + $0x1], 0 }
   0x7   :  { %16 = vsyncpa [#allocation5], 0  ;;  %s1421_s18 = smov 0   ;;  %s1423_s19 = smov 0  }
   0x8   :  { %s1425_s20 = smov 0   ;;  %s1427_s21 = smov 0  }
   0x9   :  { %s1429_s22 = smov 0   ;;  %s1431_s23 = smov 0  }
   0xa LB: > { %s1450_s24 = sadd.s32 4294967295, %s1375_s23   ;;  %s43_s25 = sadd.s32 1, %s1363_s20  ;;  %s1375_s23 = sphi %s1431_s23, %s22_s23   ;;  %s1371_s22 = sphi %s1429_s22, %s1733_s22   ;;  %s1367_s21 = sphi %s1427_s21, %s1732_s21   ;;  %s1363_s20 = sphi %s1425_s20, %s1731_s20   ;;  %s1359_s19 = sphi %s1423_s19, %s1730_s19   ;;  %s1355_s18 = sphi %s1421_s18, %s1729_s18  }
   0xb   : > { %p50_p0 = scmp.ne.s32.totalorder %s1363_s20, %s1359_s19  ;;  %p51_p1 = scmp.eq.s32.totalorder %s1375_s23, 0 }
   0xc   : > { %p56_p2 = scmp.ne.s32.totalorder %s1359_s19, %s1355_s18  ;;  %p1704_p3 = scmp.eq.s32.totalorder %s1450_s24, 0 }
   0xd   : > { %p52_p4 = por %p51_p1, %p50_p0  ;;  %p925_p5 = scmp.ge.s32.totalorder %s1375_s23, 1 }
   0xe   : > { %p1461_p6 = por %p1704_p3, %p56_p2  ;;  %p182_p7 = scmp.lt.s32.totalorder %s1375_s23, 3 }
   0xf   : > { %s1377_s28 = smov [#allocation8]   ;;  %p1089_p10 = scmp.lt.s32.totalorder %s1375_s23, 2 }
  0x10   : > { %s1713_s26 = scalar_select %p1461_p6, 1, 0 }
  0x11   : > { %p1466_p8 = pnand %p925_p5, %p182_p7  ;;  %s197_s29 = sshll.u32 %s1377_s28, 4  ;;  %s198_s29 = int_to_ptr.vmem [resolvable:$true] %s197_s29 }
  0x12   : > { %p1479_p12 = pnand %p1089_p10, %p52_p4  ;;  %s31_s7 = sadd.s32 1, %s1371_s22 }
  0x13   : > { %s1714_s27 = scalar_select %p1466_p8, 1, 0 }
  0x14   : > { %p1077_p9 = pneg %p1466_p8  ;;  %s1717_s3 = sld [smem:[#allocation16_spill]] }
  0x15   : > { %s1716_s6 = scalar_select %p1479_p12, 1, 0 }
  0x16   : > { %p1475_p11 = pnand %p1077_p9, %p1704_p3 }
  0x18   : > { %p1201_p0 = pneg %p1475_p11 }
  0x1a   : > { %s1199_s10 = scalar_lea.hbm %s1717_s3, 1024 }
  0x1b   : > { %p1200_p13 = scmp.ne.s32.totalorder %s1717_s3, %s1199_s10  ;;  %p1206_p4 = scmp.lt.u32.totalorder %s1199_s10, %s1717_s3 }
  0x1d   : > { %p1202_p1 = pnand %p1201_p0, %p1200_p13 }
  0x1f   : > { %p1203_p2 = pneg %p1202_p1 }
  0x21   : > { %p1208_p5 = pnand %p1206_p4, %p1203_p2 }
  0x23   : > { %1211 = shalt.err (!%p1208_p5)
}
  0x24   : > { %s1212_s15 = scalar_lea.vmem %s198_s29, 1024  ;;  %p1220_p3 = scmp.lt.s32.totalorder %s198_s29, %s198_s29 }
  0x25   : > { %p1213_p7 = scmp.ne.s32.totalorder %s198_s29, %s1212_s15  ;;  %p1221_p6 = scmp.lt.s32.totalorder %s1212_s15, %s1212_s15 }
  0x27   : > { %p1215_p9 = pnand %p1213_p7, %p1201_p0  ;;  %p1222_p8 = por %p1221_p6, %p1220_p3 }
  0x29   : > { %p1216_p10 = pneg %p1215_p9 }
  0x2b   : > { %p1223_p12 = pnand %p1222_p8, %p1216_p10 }
  0x2d   : > { %1226 = shalt.err (!%p1223_p12)
}
  0x2e   : > { %s1708_s16 = smov 64   ;;  %s1709_s17 = smov 4  }
  0x2f   : > { %1080 = dma.hbm_to_vmem [thread:$0]  (!%p1475_p11), %s1717_s3, 1024, %s198_s29, [#allocation7], %s1708_s16, %s1708_s16, %s1709_s17  }
  0x30   : > { %p32_p3 = scmp.ge.s32.totalorder %s31_s7, 2  ;;  %s1504_s8 = sand.u32 1, %s1363_s20  }
  0x31   : > { %s990_s9 = sshll.u32 %s1371_s22, 8  ;;  %s928_s10 = sshll.u32 %s1504_s8, 5 }
  0x32   : > { %s1735_s7 = smov (%p32_p3, %s31_s7), 0  ;;  %s1719_s0 = sld [smem:[#allocation15_spill]] }
  0x33   : > { %1718 = sst [smem:[#allocation14_spill]] %s1735_s7  ;;  %s39_s30 = ssub.s32 %s1371_s22, %s1735_s7 }
  0x34   : > { %p41_p6 = scmp.eq.s32.totalorder %s39_s30, 0  ;;  %s218_s29 = scalar_lea.vmem [#allocation3], %s928_s10 }
  0x35   : > { %s228_s14 = sshll.u32 %s218_s29, 4  ;;  %s215_s28 = scalar_lea.sflag [#allocation4], %s1504_s8  ;;  %s1522_s14 = int_to_ptr.vmem [resolvable:$true] %s228_s14 }
  0x36   : > { %s1520_s15 = scalar_select %p41_p6, %s1363_s20, %s43_s25  }
  0x37   : > { %p1720_p11 = scmp.ne.s32.totalorder %s1716_s6, 0 }
  0x38   : > { %s1515_s13 = scalar_lea.hbm %s1719_s0, %s990_s9  ;;  %s1232_s10 = scalar_lea.hbm %s1719_s0, 1024 }
  0x39   : > { %s1227_s16 = scalar_lea.hbm %s1515_s13, 512  ;;  %p1229_p12 = pneg %p1720_p11 }
  0x3a   : > { %p1228_p8 = scmp.ne.s32.totalorder %s1515_s13, %s1227_s16  ;;  %p1233_p1 = scmp.lt.u32.totalorder %s1515_s13, %s1719_s0 }
  0x3b   : > { %p1234_p2 = scmp.lt.u32.totalorder %s1232_s10, %s1227_s16  ;;  %p1236_p5 = scmp.lt.u32.totalorder %s1227_s16, %s1515_s13 }
  0x3c   : > { %p1230_p13 = pnand %p1229_p12, %p1228_p8 }
  0x3d   : > { %p1235_p4 = por %p1234_p2, %p1233_p1 }
  0x3e   : > { %p1231_p0 = pneg %p1230_p13 }
  0x3f   : > { %p1237_p7 = por %p1236_p5, %p1235_p4 }
  0x41   : > { %p1238_p9 = pnand %p1237_p7, %p1231_p0 }
  0x43   : > { %1241 = shalt.err (!%p1238_p9)
}
  0x44   : > { %s1242_s25 = scalar_lea.vmem %s1522_s14, 512  ;;  %s1380_s29 = smov [#allocation3]  }
  0x45   : > { %p1243_p10 = scmp.ne.s32.totalorder %s1522_s14, %s1242_s25  ;;  %s1247_s9 = sshll.u32 %s1380_s29, 4  ;;  %s1248_s9 = int_to_ptr.vmem [resolvable:$false] %s1247_s9 }
  0x46   : > { %s1249_s30 = scalar_lea.vmem %s1248_s9, 1024  ;;  %p1250_p8 = scmp.lt.s32.totalorder %s1522_s14, %s1248_s9 }
  0x47   : > { %p1245_p3 = pnand %p1243_p10, %p1229_p12  ;;  %p1251_p13 = scmp.lt.s32.totalorder %s1249_s30, %s1242_s25 }
  0x49   : > { %p1246_p6 = pneg %p1245_p3  ;;  %p1252_p1 = por %p1251_p13, %p1250_p8 }
  0x4b   : > { %p1253_p2 = pnand %p1252_p1, %p1246_p6 }
  0x4d   : > { %1256 = shalt.err (!%p1253_p2)
}
  0x4e   : > { %s1381_s16 = smov 512   ;;  %s1382_s10 = smov 256  }
  0x4f   : > { %s1383_s11 = smov 16   ;;  %s931_s12 = sshll.u32 %s1504_s8, 8 }
  0x50   : > { %1084 = dma.hbm_to_vmem [thread:$0]  (!%p1720_p11), %s1515_s13, 512, %s1522_s14, %s215_s28, %s1381_s16, %s1382_s10, %s1383_s11  }
  0x51   : > { %s991_s29 = sshll.u32 %s1371_s22, 12  ;;  %s242_s17 = scalar_lea.vmem [#allocation6], %s931_s12 }
  0x52   : > { %s1558_s30 = scalar_lea.hbm %s1699_s1, %s991_s29  ;;  %s249_s18 = sshll.u32 %s242_s17, 4  ;;  %s1560_s18 = int_to_ptr.vmem [resolvable:$true] %s249_s18 }
  0x53   : > { %s1721_s0 = sand.u32 1, %s1375_s23   ;;  %s1257_s7 = scalar_lea.hbm %s1558_s30, 4096 }
  0x54   : > { %s1564_s3 = scalar_lea.sflag [#allocation7], %s1721_s0  ;;  %p1258_p0 = scmp.ne.s32.totalorder %s1558_s30, %s1257_s7 }
  0x55   : > { %s1262_s14 = scalar_lea.hbm %s1699_s1, 8192  ;;  %p1263_p7 = scmp.lt.u32.totalorder %s1558_s30, %s1699_s1 }
  0x56   : > { %p1260_p4 = pnand %p1258_p0, %p1229_p12  ;;  %p1264_p9 = scmp.lt.u32.totalorder %s1262_s14, %s1257_s7 }
  0x57   : > { %p1266_p3 = scmp.lt.u32.totalorder %s1257_s7, %s1558_s30 }
  0x58   : > { %p1261_p5 = pneg %p1260_p4  ;;  %p1265_p10 = por %p1264_p9, %p1263_p7 }
  0x5a   : > { %p1267_p6 = por %p1266_p3, %p1265_p10 }
  0x5c   : > { %p1268_p8 = pnand %p1267_p6, %p1261_p5 }
  0x5e   : > { %1271 = shalt.err (!%p1268_p8)
}
  0x5f   : > { %s1272_s0 = scalar_lea.vmem %s1560_s18, 4096  ;;  %s1384_s17 = smov [#allocation6]  }
  0x60   : > { %p1273_p13 = scmp.ne.s32.totalorder %s1560_s18, %s1272_s0  ;;  %s1277_s10 = sshll.u32 %s1384_s17, 4  ;;  %s1278_s10 = int_to_ptr.vmem [resolvable:$false] %s1277_s10 }
  0x61   : > { %s1279_s11 = scalar_lea.vmem %s1278_s10, 8192  ;;  %p1280_p0 = scmp.lt.s32.totalorder %s1560_s18, %s1278_s10 }
  0x62   : > { %p1275_p1 = pnand %p1273_p13, %p1229_p12  ;;  %p1281_p4 = scmp.lt.s32.totalorder %s1279_s11, %s1272_s0 }
  0x64   : > { %p1276_p2 = pneg %p1275_p1  ;;  %p1282_p7 = por %p1281_p4, %p1280_p0 }
  0x66   : > { %p1283_p9 = pnand %p1282_p7, %p1276_p2 }
  0x68   : > { %1286 = shalt.err (!%p1283_p9)
}
  0x69   : > { %s1722_s7 = smov 4   ;;  %s1723_s12 = smov 64  }
  0x6a   : > { %1087 = dma.hbm_to_vmem [thread:$0]  (!%p1720_p11), %s1558_s30, 4096, %s1560_s18, %s1564_s3, %s1723_s12, %s1723_s12, %s1722_s7  }
  0x6b   : > { %p1724_p12 = scmp.ne.s32.totalorder %s1714_s27, 0 }
  0x6c   : > { %s263_s29 = sand.u32 (!%p1724_p12), 1, %s1359_s19   ;;  %p1725_p5 = scmp.ne.s32.totalorder (!%p1724_p12), %s1713_s26, 0 }
  0x6d   : > { %261 = sbr.rel (%p1724_p12) target bundleno = 643 (0x283), region = 40  ;;  %s935_s25 = sshll.u32 (!%p1724_p12), %s263_s29, 5 }
  0x6e   : > { %s264_s9 = scalar_lea.sflag (!%p1724_p12), [#allocation4], %s263_s29  ;;  %s1596_s8 = scalar_lea.vmem (!%p1724_p12), [#allocation3], %s935_s25 }
  0x74   : > { %1338 = dma.done.wait (%p1725_p5), %s264_s9, 512  }
  0x75   : > { %1340 = vsyncadd (%p1725_p5), %s264_s9, 4294966784  ;;  %s272_s6 = sand.u32 1, %s1450_s24   ;;  %s936_s13 = sshll.u32 %s263_s29, 8 }
  0x76   : > { %s273_s3 = scalar_lea.sflag [#allocation7], %s272_s6  ;;  %s1603_s18 = scalar_lea.vmem [#allocation6], %s936_s13 }
  0x77   : > { %1342 = dma.done.wait (%p1725_p5), %s273_s3, 4096  }
  0x78   : > { %1344 = vsyncadd (%p1725_p5), %s273_s3, 4294963200  ;;  %p1726_p11 = scmp.eq.s32.totalorder %s1450_s24, 0 }
  0x7a   : > { %1346 = dma.done.wait (%p1726_p11), [#allocation7], 1024   ;;  %p1727_p10 = pmov %p1726_p11 }
  0x7b   : > { %p938_p3 = scmp.ne.s32.totalorder %s1367_s21, 0 }
  0x7c   : > { %1348 = vsyncadd (%p1727_p10), [#allocation7], 4294966272  ;;  %v1385_v0 = vmov (!%p938_p3), 0.0  }
  0x7d   : > { %315 = sbr.rel (%p938_p3) target bundleno = 132 (0x84), region = 56  ;;  %316 = vst [vmem:[#allocation2] sm:$0xff] (!%p938_p3), %v1385_v0  ;;  %317 = vst [vmem:[#allocation2 + $0x8] sm:$0xff] (!%p938_p3), %v1385_v0 }
  0x84 PF: > { %v1153_v1 = vld [vmem:[%s1603_s18 + $0x40] sm:$0xff]   ;;  %v1157_v5 = vld [vmem:[%s1603_s18 + $0x48] sm:$0xff]   ;;  %v1161_v9 = vld [vmem:[%s1603_s18 + $0x50] sm:$0xff]   ;;  %p975_p6 = scmp.ne.s32.totalorder %s1367_s21, 1 }
  0x85   : > { %v1154_v2 = vld [vmem:[%s1603_s18 + $0xc0] sm:$0xff]   ;;  %992 = vmatprep.subr.bf16.mxu0 %v1153_v1  ;;  %v1158_v6 = vld [vmem:[%s1603_s18 + $0xc8] sm:$0xff]   ;;  %v1162_v10 = vld [vmem:[%s1603_s18 + $0xd0] sm:$0xff]   ;;  %v1386_v56 = vmov (!%p975_p6), 0.0   ;;  %vm1387_vm0 = vmmov (!%p975_p6), 0  }
  0x86   : > { %v1155_v3 = vld [vmem:[%s1603_s18] sm:$0xff]   ;;  %1014 = vmatprep.subr.bf16.mxu1 %v1154_v2  ;;  %v1159_v7 = vld [vmem:[%s1603_s18 + $0x8] sm:$0xff]   ;;  %v1163_v11 = vld [vmem:[%s1603_s18 + $0x10] sm:$0xff]  }
  0x87   : > { %v1156_v4 = vld [vmem:[%s1603_s18 + $0x80] sm:$0xff]   ;;  %993 = vmatpush3.bf16.msra.mxu0 %v1155_v3  ;;  %v1160_v8 = vld [vmem:[%s1603_s18 + $0x88] sm:$0xff]   ;;  %v1164_v12 = vld [vmem:[%s1603_s18 + $0x90] sm:$0xff]  }
  0x88   : > { %1015 = vmatpush3.bf16.msra.mxu1 %v1156_v4  ;;  %994 = vmatprep.subr.bf16.mxu0 %v1157_v5  ;;  %v1165_v13 = vld [vmem:[%s1603_s18 + $0x58] sm:$0xff]   ;;  %v1169_v17 = vld [vmem:[%s1603_s18 + $0x60] sm:$0xff]   ;;  %v1173_v21 = vld [vmem:[%s1603_s18 + $0x68] sm:$0xff]  }
  0x89   : > { %1016 = vmatprep.subr.bf16.mxu1 %v1158_v6  ;;  %v1166_v14 = vld [vmem:[%s1603_s18 + $0xd8] sm:$0xff]   ;;  %v1170_v18 = vld [vmem:[%s1603_s18 + $0xe0] sm:$0xff]   ;;  %v1174_v22 = vld [vmem:[%s1603_s18 + $0xe8] sm:$0xff]  }
  0x8a   : > { %v1167_v15 = vld [vmem:[%s1603_s18 + $0x18] sm:$0xff]   ;;  %v1171_v19 = vld [vmem:[%s1603_s18 + $0x20] sm:$0xff]   ;;  %v1175_v23 = vld [vmem:[%s1603_s18 + $0x28] sm:$0xff]  }
  0x8b   : > { %995 = vmatpush3.bf16.msra.mxu0 %v1159_v7  ;;  %v1168_v16 = vld [vmem:[%s1603_s18 + $0x98] sm:$0xff]   ;;  %v1172_v20 = vld [vmem:[%s1603_s18 + $0xa0] sm:$0xff]   ;;  %v1176_v24 = vld [vmem:[%s1603_s18 + $0xa8] sm:$0xff]  }
  0x8c   : > { %1017 = vmatpush3.bf16.msra.mxu1 %v1160_v8  ;;  %996 = vmatprep.subr.bf16.mxu0 %v1161_v9  ;;  %v1177_v25 = vld [vmem:[%s1603_s18 + $0x70] sm:$0xff]   ;;  %v1181_v29 = vld [vmem:[%s1603_s18 + $0x78] sm:$0xff]   ;;  %v1191_v55 = vld [vmem:[#allocation8] sm:$0xff] (!%p975_p6)  }
  0x8d   : > { %1018 = vmatprep.subr.bf16.mxu1 %v1162_v10  ;;  %v1178_v26 = vld [vmem:[%s1603_s18 + $0xf0] sm:$0xff]   ;;  %v1182_v30 = vld [vmem:[%s1603_s18 + $0xf8] sm:$0xff]   ;;  %v1192_v57 = vld [vmem:[#allocation8 + $0x8] sm:$0xff] (!%p975_p6)  }
  0x8e   : > { %v1179_v27 = vld [vmem:[%s1603_s18 + $0x30] sm:$0xff]   ;;  %v1183_v31 = vld [vmem:[%s1603_s18 + $0x38] sm:$0xff]   ;;  %v1195_v60 = vld [vmem:[#allocation8 + $0x20] sm:$0xff] (!%p975_p6)  }
  0x8f   : > { %997 = vmatpush3.bf16.msra.mxu0 %v1163_v11  ;;  %v1180_v28 = vld [vmem:[%s1603_s18 + $0xb0] sm:$0xff]   ;;  %v1184_v32 = vld [vmem:[%s1603_s18 + $0xb8] sm:$0xff]   ;;  %v1196_v61 = vld [vmem:[#allocation8 + $0x28] sm:$0xff] (!%p975_p6)  }
  0x90   : > { %1019 = vmatpush3.bf16.msra.mxu1 %v1164_v12  ;;  %998 = vmatprep.subr.bf16.mxu0 %v1165_v13  ;;  %v1185_v33 = vld [vmem:[%s1596_s8] ss:$16 sps:$4 sm:$0xff]   ;;  %v1187_v34 = vld [vmem:[%s1596_s8 + $0x4] ss:$16 sps:$4 sm:$0xff]   ;;  %v1188_v35 = vld [vmem:[%s1596_s8 + $0x8] ss:$16 sps:$4 sm:$0xff]  }
  0x91   : > { %1020 = vmatprep.subr.bf16.mxu1 %v1166_v14  ;;  %v1190_v36 = vld [vmem:[%s1596_s8 + $0xc] ss:$16 sps:$4 sm:$0xff]   ;;  %632 = vmatprep.mubr.bf16.mxu0 %v1187_v34  ;;  %v318_v46 = vld [vmem:[#allocation2] sm:$0xff] }
  0x92   : > { %673 = vmatprep.mubr.bf16.mxu1 %v1190_v36  ;;  %v319_v51 = vld [vmem:[#allocation2 + $0x8] sm:$0xff]  ;;  %v1193_v58 = vld [vmem:[#allocation8 + $0x10] sm:$0xff] (!%p975_p6)  }
  0x93   : > { %999 = vmatpush3.bf16.msra.mxu0 %v1167_v15  ;;  %v1194_v59 = vld [vmem:[#allocation8 + $0x18] sm:$0xff] (!%p975_p6)   ;;  %v1197_v62 = vld [vmem:[#allocation8 + $0x30] sm:$0xff] (!%p975_p6)  }
  0x94   : > { %1021 = vmatpush3.bf16.msra.mxu1 %v1168_v16  ;;  %1000 = vmatprep.subr.bf16.mxu0 %v1169_v17  ;;  %v976_v1 = vld [vmem:[%s1700_s2] ss:$0 sm:$0xff] (!%p975_p6)  ;;  %v1198_v4 = vld [vmem:[#allocation8 + $0x38] sm:$0xff] (!%p975_p6)  }
  0x95   : > { %1022 = vmatprep.subr.bf16.mxu1 %v1170_v18  ;;  %v977_v6 = vld [vmem:[%s1702_s4] ss:$0 sm:$0xff] (!%p975_p6) }
  0x97   : > { %1001 = vmatpush3.bf16.msra.mxu0 %v1171_v19 }
  0x98   : > { %1023 = vmatpush3.bf16.msra.mxu1 %v1172_v20  ;;  %1002 = vmatprep.subr.bf16.mxu0 %v1173_v21 }
  0x99   : > { %1024 = vmatprep.subr.bf16.mxu1 %v1174_v22 }
  0x9b   : > { %1003 = vmatpush3.bf16.msra.mxu0 %v1175_v23 }
  0x9c   : > { %1025 = vmatpush3.bf16.msra.mxu1 %v1176_v24  ;;  %1004 = vmatprep.subr.bf16.mxu0 %v1177_v25 }
  0x9d   : > { %1026 = vmatprep.subr.bf16.mxu1 %v1178_v26 }
  0x9f   : > { %1005 = vmatpush3.bf16.msra.mxu0 %v1179_v27 }
  0xa0   : > { %1027 = vmatpush3.bf16.msra.mxu1 %v1180_v28  ;;  %1006 = vmatprep.subr.bf16.mxu0 %v1181_v29 }
  0xa1   : > { %1028 = vmatprep.subr.bf16.mxu1 %v1182_v30 }
  0xa3   : > { %1007 = vmatpush3.bf16.msra.mxu0 %v1183_v31 }
  0xa4   : > { %1029 = vmatpush3.bf16.msra.mxu1 %v1184_v32  ;;  %1045 = vmatprep.subr.bf16.mxu0 (!%p975_p6), %v1386_v56 }
  0xa6   : > { %633 = vmatmul.mubr.bf16.vlgmr.msra.gmra.mrb[0].mxu0 %v1185_v33 }
  0xa7   : > { %674 = vmatmul.mubr.bf16.vlgmr.msra.gmra.mrb[0].mxu1 %v1188_v35  ;;  %1046 = vmatpush3.bf16.msra.mxu0 (!%p975_p6), %v1191_v55 }
  0xa8   : > { %1061 = vmatprep.mubr.msk.bf16.mxu0 (!%p975_p6), %vm1387_vm0, %v1386_v56  ;;  %1047 = vmatprep.subr.bf16.mxu0 (!%p975_p6), %v1386_v56 }
  0xab   : > { %1048 = vmatpush3.bf16.msra.mxu0 (!%p975_p6), %v1192_v57 }
  0xac   : > { %1049 = vmatprep.subr.bf16.mxu0 (!%p975_p6), %v1386_v56 }
  0xaf   : > { %1050 = vmatpush3.bf16.msra.mxu0 (!%p975_p6), %v1193_v58 }
  0xb0   : > { %1051 = vmatprep.subr.bf16.mxu0 (!%p975_p6), %v1386_v56 }
  0xb3   : > { %1052 = vmatpush3.bf16.msra.mxu0 (!%p975_p6), %v1194_v59 }
  0xb4   : > { %1053 = vmatprep.subr.bf16.mxu0 (!%p975_p6), %v1386_v56 }
  0xb7   : > { %1054 = vmatpush3.bf16.msra.mxu0 (!%p975_p6), %v1195_v60 }
  0xb8   : > { %1055 = vmatprep.subr.bf16.mxu0 (!%p975_p6), %v1386_v56 }
  0xbb   : > { %1056 = vmatpush3.bf16.msra.mxu0 (!%p975_p6), %v1196_v61 }
  0xbc   : > { %1057 = vmatprep.subr.bf16.mxu0 (!%p975_p6), %v1386_v56 }
  0xbf   : > { %1058 = vmatpush3.bf16.msra.mxu0 (!%p975_p6), %v1197_v62 }
  0xc0   : > { %1059 = vmatprep.subr.bf16.mxu0 (!%p975_p6), %v1386_v56 }
  0xc3   : > { %1060 = vmatpush3.bf16.msra.mxu0 (!%p975_p6), %v1198_v4 }
 0x179   : > { %v1008_v37 = vpop.f32.mrb[0].mxu0 }
 0x17a   : > { %v1030_v38 = vpop.f32.mrb[0].mxu1  ;;  %v1009_v39 = vpop.f32.mrb[1].mxu0 }
 0x17b   : > { %v1010_v40 = vadd.f32 %v1009_v39, %v1008_v37  ;;  %v1031_v41 = vpop.f32.mrb[1].mxu1  ;;  %v1011_v42 = vpop.f32.mrb[2].mxu0 }
 0x17c   : > { %v1032_v43 = vadd.f32 %v1031_v41, %v1030_v38  ;;  %v1033_v44 = vpop.f32.mrb[2].mxu1  ;;  %v1012_v45 = vpop.f32.mrb[3].mxu0 }
 0x17d   : > { %v1013_v47 = vadd.f32 %v1012_v45, %v1011_v42  ;;  %v1034_v48 = vpop.f32.mrb[3].mxu1 }
 0x17e   : > { %v676_v49 = vadd.f32 %v1032_v43, %v1010_v40  ;;  %v1035_v50 = vadd.f32 %v1034_v48, %v1033_v44  ;;  %689 = sbr.rel (%p975_p6) target bundleno = 617 (0x269), region = 60 }
 0x180   : > { %v682_v52 = vadd.f32 %v676_v49, %v318_v46  ;;  %v679_v53 = vadd.f32 %v1035_v50, %v1013_v47 }
 0x182   : > { %684 = vst [vmem:[#allocation2] sm:$0xff] %v682_v52  ;;  %v683_v54 = vadd.f32 %v679_v53, %v319_v51 }
 0x184   : > { %685 = vst [vmem:[#allocation2 + $0x8] sm:$0xff] %v683_v54 }
 0x189   : > { %v690_v63 = vld [vmem:[#allocation2] sm:$0xff] }
 0x18a   : > { %v699_v2 = vadd.f32 %v976_v1, %v690_v63 }
 0x18b   : > { %v691_v0 = vld [vmem:[#allocation2 + $0x8] sm:$0xff] }
 0x18c   : > { %v700_v3 = vadd.f32 %v976_v1, %v691_v0 }
 0x18e   : > { %v701_v5 = vpack.c.bf16 %v700_v3, %v699_v2 }
 0x190   : > { %1062 = vmatmul.mubr.bf16.vlgmr.msra.gmra.mrb[0].mxu0 %v701_v5 }
 0x263   : > { %v807_v7 = vpop.f32.mrb[0].mxu0 }
 0x264   : > { %v808_v8 = vadd.f32 %v977_v6, %v807_v7  ;;  %v1063_v9 = vpop.f32.mrb[1].mxu0 }
 0x265   : > { %v810_v10 = vpop.f32.mrb[2].mxu0 }
 0x266   : > { %814 = vst [vmem:[#allocation9] sm:$0xff] %v808_v8  ;;  %v811_v11 = vadd.f32 %v977_v6, %v810_v10  ;;  %v1064_v12 = vpop.f32.mrb[3].mxu0 }
 0x268   : > { %815 = vst [vmem:[#allocation9 + $0x8] sm:$0xff] %v811_v11 }
 0x269 PF: > { %p1091_p8 = scmp.eq.s32.totalorder %s1450_s24, 1  ;;  %s1388_s14 = smov [#allocation9]  }
 0x26a   : > { %s825_s28 = sshll.u32 %s1388_s14, 4  ;;  %s826_s28 = int_to_ptr.vmem [resolvable:$true] %s825_s28 }
 0x26b   : > { %s1287_s16 = scalar_lea.vmem %s826_s28, 256  ;;  %p1294_p0 = scmp.lt.s32.totalorder %s826_s28, %s826_s28 }
 0x26c   : > { %p1288_p13 = scmp.ne.s32.totalorder %s826_s28, %s1287_s16  ;;  %p1295_p4 = scmp.lt.s32.totalorder %s1287_s16, %s1287_s16 }
 0x26e   : > { %p1289_p1 = pnand %p1288_p13, %p1091_p8  ;;  %p1296_p7 = por %p1295_p4, %p1294_p0 }
 0x270   : > { %p1290_p2 = pneg %p1289_p1 }
 0x272   : > { %p1297_p9 = pnand %p1296_p7, %p1290_p2 }
 0x274   : > { %1300 = shalt.err (!%p1297_p9)
}
 0x275   : > { %s1301_s10 = scalar_lea.hbm %s1703_s5, 256 }
 0x276   : > { %p1302_p12 = scmp.ne.s32.totalorder %s1703_s5, %s1301_s10  ;;  %p1307_p10 = scmp.lt.u32.totalorder %s1301_s10, %s1703_s5 }
 0x278   : > { %p1303_p5 = pnand %p1302_p12, %p1091_p8 }
 0x27a   : > { %p1304_p11 = pneg %p1303_p5 }
 0x27c   : > { %p1309_p3 = pnand %p1307_p10, %p1304_p11 }
 0x27e   : > { %1312 = shalt.err (!%p1309_p3)
}
 0x27f   : > { %s1389_s25 = smov 128   ;;  %s1390_s9 = smov 8  }
 0x280   : > { %1074 = dma.vmem_to_hbm [thread:$0]  (%p1091_p8), %s826_s28, 256, %s1703_s5, [#allocation5], %s1389_s25, %s1389_s25, %s1390_s9  }
 0x281   : > { %1350 = dma.done.wait (%p1091_p8), [#allocation5], 256  }
 0x282   : > { %1352 = vsyncadd (%p1091_p8), [#allocation5], 4294967040 }
 0x283 PF: > { %s22_s23 = sadd.s32 1, %s1375_s23   ;;  %s1728_s13 = sld [smem:[#allocation14_spill]] }
 0x284   : > { %p19_p6 = scmp.ge.s32.totalorder %s22_s23, 4   ;;  %s1729_s18 = smov %s1359_s19 }
 0x285   : > { %s1730_s19 = smov %s1363_s20  ;;  %s1731_s20 = smov %s1520_s15 }
 0x286   : > { %s1732_s21 = smov %s1371_s22  ;;  %21 = sbr.rel (!%p19_p6) target bundleno = 10 (0xa), region = 103 }
 0x289   : > { %s1733_s22 = smov %s1728_s13 }
 0x28d   :  { %841 = vsyncpa [#allocation4], 1 }
 0x28e   :  { %843 = vsyncpa [#allocation4 + $0x1], 1 }
 0x28f   :  { %844 = vsyncpa [#allocation7], 1 }
 0x290   :  { %846 = vsyncpa [#allocation7 + $0x1], 1 }
 0x291   :  { %847 = vsyncpa [#allocation5], 1 }
 0x292   :  { %849 = vsyncpa [#allocation5 + $0x1], 1 }

</bundles_post_ra>
